<compile_context>
chip_gen: v6e
topology: v6e:2x2x1
jax: 0.10.0
libtpu: 0.0.40
codegen_flags: <defaults>
</compile_context>

<pallas_src>
import functools

import jax
import jax.numpy as jnp
from jax.experimental import pallas as pl
from jax.experimental.pallas import tpu as pltpu


def _pick_vmem_limit():
    """Per-generation VMEM limit: leave headroom on 64 MiB parts (v7x)."""
    cap = 128 * 1024 * 1024
    try:
        info = pltpu.get_tpu_info()
        cap = int(getattr(info, "vmem_capacity_bytes", cap)) or cap
    except Exception:
        cap = 128 * 1024 * 1024
    if cap <= 64 * 1024 * 1024:
        return 48 * 1024 * 1024   # v7x-class: 64 MiB physical per TC
    return 64 * 1024 * 1024       # v5e / v6e: 128 MiB physical


def _choose_tile_n(n, c, itemsize, vmem_limit):
    """Rows per tile from a VMEM byte budget (inputs + f32 temporaries)."""
    align = 8 if itemsize >= 4 else (16 if itemsize == 2 else 32)
    c_pad = ((c + 127) // 128) * 128
    # Per-row VMEM bytes:
    #   2x double-buffered logits block (native dtype, lane padded)
    #   2x double-buffered targets column ((tn,1) int32 pads to (tn,128))
    #   ~2 full-width f32 compute temporaries live at once (exp tile + transient)
    bytes_per_row = 2 * c_pad * itemsize + 2 * 128 * 4 + 2 * c_pad * 4
    budget = int(vmem_limit * 0.75)            # headroom for outputs / scratch
    tn_budget = budget // bytes_per_row
    # ~4 MiB of logits bytes per tile: DMA time >> per-grid-step overhead.
    tn_dma = (4 * 1024 * 1024) // max(1, c_pad * itemsize)
    tn = max(align, min(tn_budget, tn_dma))
    tn = max(align, (tn // align) * align)

    if n < 2 * align:
        return n                               # single full-extent tile (legal)
    # Keep >= 2 tiles so both v7x TensorCores get work on the parallel axis.
    half = -(-((n + 1) // 2) // align) * align
    return max(align, min(tn, half))


def _focal_loss_kernel(logits_ref, targets_ref, out_ref, *,
                       alpha, gamma, reduction, n_total):
    x = logits_ref[...]                                   # (tn, C) native dtype
    tgt = targets_ref[...]                                # (tn, 1) int32
    tn, c = x.shape

    # Row max on the native dtype (exact for bf16/f32) — no f32 tile copy.
    m = jnp.max(x, axis=-1, keepdims=True)                # (tn, 1)

    # Gather the target logit from the raw logits via one-hot select + sum
    # (exact: exactly one nonzero per row).  Iota is (1, C), broadcast in the
    # compare, so no (tn, C) int32 index tile is materialized.
    col = jax.lax.broadcasted_iota(jnp.int32, (1, c), 1)  # (1, C)
    picked = jnp.sum(jnp.where(col == tgt, x, jnp.zeros((), x.dtype)),
                     axis=-1, keepdims=True)              # (tn, 1) native dtype

    # Cast folded into the subtract/exp: only `e` is a full-size f32 temporary.
    e = jnp.exp(x.astype(jnp.float32) - m.astype(jnp.float32))   # (tn, C) f32
    lse = jnp.log(jnp.sum(e, axis=-1, keepdims=True))            # (tn, 1)

    ce = lse + (m.astype(jnp.float32) - picked.astype(jnp.float32))
    ce = jnp.maximum(ce, 0.0)   # guard fp rounding so pt <= 1

    # Mask padded tail rows of the last tile (blocks any garbage / Inf / NaN).
    row = (pl.program_id(0) * tn
           + jax.lax.broadcasted_iota(jnp.int32, (tn, 1), 0))
    ce = jnp.where(row < n_total, ce, 0.0)

    # Focal modulation — row-wise (tn, 1) work only.
    pt = jnp.exp(-ce)
    one_minus_pt = jnp.maximum(1.0 - pt, 0.0)
    g = float(gamma)
    if g == 2.0:
        mod = one_minus_pt * one_minus_pt
    elif g == 1.0:
        mod = one_minus_pt
    elif g == 0.0:
        mod = jnp.ones_like(one_minus_pt)
    else:
        mod = one_minus_pt ** jnp.float32(g)
    focal = jnp.float32(alpha) * mod * ce                 # (tn, 1) f32

    if reduction in ("mean", "sum"):
        # One (8,128)-aligned partial-sum block per grid step (keeps the grid
        # axis "parallel"; the tiny final reduction happens in the wrapper).
        out_ref[...] = jnp.broadcast_to(jnp.sum(focal), out_ref.shape)
    else:  # 'none'
        out_ref[...] = focal


def focal_loss(logits, targets, *, alpha=1.0, gamma=2.0, reduction="mean"):
    """Pallas TPU implementation of FocalLoss.forward.

    logits: (N, C) float array (any float dtype; cast happens in-kernel)
    targets: (N,) int array of class indices
    """
    if reduction not in ("mean", "sum", "none"):
        raise ValueError(f"unknown reduction: {reduction}")

    n, c = logits.shape
    targets_col = targets.astype(jnp.int32).reshape(n, 1)

    itemsize = jnp.dtype(logits.dtype).itemsize
    vmem_limit = _pick_vmem_limit()
    tn = _choose_tile_n(n, c, itemsize, vmem_limit)
    num_tiles = -(-n // tn)

    kernel = functools.partial(
        _focal_loss_kernel,
        alpha=float(alpha),
        gamma=float(gamma),
        reduction=reduction,
        n_total=n,
    )

    if reduction in ("mean", "sum"):
        out_shape = jax.ShapeDtypeStruct((num_tiles, 8, 128), jnp.float32)
        out_spec = pl.BlockSpec((1, 8, 128), lambda i: (i, 0, 0))
    else:
        out_shape = jax.ShapeDtypeStruct((n, 1), jnp.float32)
        out_spec = pl.BlockSpec((tn, 1), lambda i: (i, 0))

    result = pl.pallas_call(
        kernel,
        out_shape=out_shape,
        grid=(num_tiles,),
        in_specs=[
            pl.BlockSpec((tn, c), lambda i: (i, 0)),   # logits tile (native dtype)
            pl.BlockSpec((tn, 1), lambda i: (i, 0)),   # targets column
        ],
        out_specs=out_spec,
        compiler_params=pltpu.CompilerParams(
            dimension_semantics=("parallel",),         # 2-TC sharding on v7x
            vmem_limit_bytes=vmem_limit,
        ),
    )(logits, targets_col)

    if reduction == "mean":
        return jnp.sum(result[:, 0, 0]) / jnp.float32(n)
    if reduction == "sum":
        return jnp.sum(result[:, 0, 0])
    return result[:, 0]


def _focal_loss_ref(logits, targets, alpha=1.0, gamma=2.0, reduction="mean"):
    """Pure-JAX reference matching the PyTorch module semantics."""
    logits = logits.astype(jnp.float32)
    lse = jax.nn.logsumexp(logits, axis=-1)
    picked = jnp.take_along_axis(logits, targets[:, None], axis=-1)[:, 0]
    ce = lse - picked
    pt = jnp.exp(-ce)
    focal = alpha * (1.0 - pt) ** gamma * ce
    if reduction == "mean":
        return focal.mean()
    if reduction == "sum":
        return focal.sum()
    return focal


if __name__ == "__main__":
    key = jax.random.PRNGKey(0)
    k1, k2, k3, k4, k5, k6 = jax.random.split(key, 6)

    # Case 1: tiny single-tile (N=8, C=32), f32.
    N, C = 8, 32
    logits = jax.random.normal(k1, (N, C), dtype=jnp.float32)
    targets = jax.random.randint(k2, (N,), 0, C, dtype=jnp.int32)
    for red in ("mean", "sum", "none"):
        out = jax.block_until_ready(
            focal_loss(logits, targets, alpha=1.0, gamma=2.0, reduction=red))
        ref = _focal_loss_ref(logits, targets, alpha=1.0, gamma=2.0, reduction=red)
        assert jnp.allclose(out, ref, atol=1e-5, rtol=1e-5), (red, out, ref)

    # Case 2: multi-tile with a padded tail (N=50, C=96), f32 — exercises the
    # >=2-tile split and the row mask on the last tile.
    N, C = 50, 96
    logits = jax.random.normal(k3, (N, C), dtype=jnp.float32)
    targets = jax.random.randint(k4, (N,), 0, C, dtype=jnp.int32)
    for red in ("mean", "sum", "none"):
        out = jax.block_until_ready(
            focal_loss(logits, targets, alpha=0.25, gamma=2.0, reduction=red))
        ref = _focal_loss_ref(logits, targets, alpha=0.25, gamma=2.0, reduction=red)
        assert jnp.allclose(out, ref, atol=1e-5, rtol=1e-5), (red, out, ref)

    # Case 3: bf16 inputs (native dtype DMA'd in, cast in-kernel), mean.
    N, C = 64, 128
    logits = jax.random.normal(k5, (N, C), dtype=jnp.bfloat16)
    targets = jax.random.randint(k6, (N,), 0, C, dtype=jnp.int32)
    out = jax.block_until_ready(focal_loss(logits, targets, reduction="mean"))
    ref = _focal_loss_ref(logits, targets, reduction="mean")
    assert jnp.allclose(out, ref, atol=5e-2, rtol=2e-2), (out, ref)

    print("KERNEL_OK")
</pallas_src>

<mosaic_0001>
module attributes {stable_mosaic.version = 11 : i64} {
  func.func @_focal_loss_kernel(%arg0: i32, %arg1: memref<8x32xf32, #tpu.memory_space<vmem>>, %arg2: memref<8x1xi32, #tpu.memory_space<vmem>>, %arg3: memref<1x8x128xf32, #tpu.memory_space<vmem>>) attributes {dimension_semantics = [#tpu.dimension_semantics<parallel>], iteration_bounds = array<i64: 1>, scalar_prefetch = 0 : i64, scratch_operands = 0 : i64, tpu.core_type = #tpu.core_type<tc>, window_params = [{transform_indices = @transform_0, window_bounds = array<i64: 8, 32>}, {transform_indices = @transform_1, window_bounds = array<i64: 8, 1>}, {transform_indices = @transform_2, window_bounds = array<i64: 1, 8, 128>}]} {
    %c0 = arith.constant 0 : index
    %c0_0 = arith.constant 0 : index
    %0 = vector.load %arg1[%c0, %c0_0] : memref<8x32xf32, #tpu.memory_space<vmem>>, vector<8x32xf32>
    %c0_1 = arith.constant 0 : index
    %c0_2 = arith.constant 0 : index
    %1 = vector.load %arg2[%c0_1, %c0_2] : memref<8x1xi32, #tpu.memory_space<vmem>>, vector<8x1xi32>
    %cst = arith.constant dense<0xFF800000> : vector<8xf32>
    %2 = vector.multi_reduction <maximumf>, %0, %cst [1] : vector<8x32xf32> to vector<8xf32>
    %3 = vector.shape_cast %2 : vector<8xf32> to vector<8x1xf32>
    %4 = tpu.iota {dimensions = array<i32: 1>} : vector<1x32xi32>
    %5 = vector.broadcast %4 : vector<1x32xi32> to vector<8x32xi32>
    %6 = vector.broadcast %1 : vector<8x1xi32> to vector<8x32xi32>
    %7 = arith.cmpi eq, %5, %6 : vector<8x32xi32>
    %cst_3 = arith.constant 0.000000e+00 : f32
    %8 = vector.broadcast %cst_3 : f32 to vector<8x32xf32>
    %9 = arith.select %7, %0, %8 : vector<8x32xi1>, vector<8x32xf32>
    %cst_4 = arith.constant dense<0.000000e+00> : vector<8xf32>
    %10 = vector.multi_reduction <add>, %9, %cst_4 [1] : vector<8x32xf32> to vector<8xf32>
    %11 = vector.shape_cast %10 : vector<8xf32> to vector<8x1xf32>
    %12 = vector.broadcast %3 : vector<8x1xf32> to vector<8x32xf32>
    %13 = arith.subf %0, %12 : vector<8x32xf32>
    %14 = math.exp %13 : vector<8x32xf32>
    %cst_5 = arith.constant dense<0.000000e+00> : vector<8xf32>
    %15 = vector.multi_reduction <add>, %14, %cst_5 [1] : vector<8x32xf32> to vector<8xf32>
    %16 = vector.shape_cast %15 : vector<8xf32> to vector<8x1xf32>
    %17 = math.log %16 : vector<8x1xf32>
    %18 = arith.subf %3, %11 : vector<8x1xf32>
    %19 = arith.addf %17, %18 : vector<8x1xf32>
    %cst_6 = arith.constant 0.000000e+00 : f32
    %20 = vector.broadcast %cst_6 : f32 to vector<8x1xf32>
    %21 = arith.maximumf %19, %20 : vector<8x1xf32>
    %c8_i32 = arith.constant 8 : i32
    %22 = arith.muli %arg0, %c8_i32 : i32
    %23 = tpu.iota {dimensions = array<i32: 0>} : vector<8x1xi32>
    %24 = vector.broadcast %22 : i32 to vector<8x1xi32>
    %25 = arith.addi %24, %23 : vector<8x1xi32>
    %c8_i32_7 = arith.constant 8 : i32
    %26 = vector.broadcast %c8_i32_7 : i32 to vector<8x1xi32>
    %27 = arith.cmpi slt, %25, %26 : vector<8x1xi32>
    %cst_8 = arith.constant 0.000000e+00 : f32
    %28 = vector.broadcast %cst_8 : f32 to vector<8x1xf32>
    %29 = arith.select %27, %21, %28 : vector<8x1xi1>, vector<8x1xf32>
    %cst_9 = arith.constant 0.000000e+00 : f32
    %30 = vector.broadcast %cst_9 : f32 to vector<8x1xf32>
    %31 = arith.subf %30, %29 : vector<8x1xf32>
    %32 = math.exp %31 : vector<8x1xf32>
    %cst_10 = arith.constant 1.000000e+00 : f32
    %33 = vector.broadcast %cst_10 : f32 to vector<8x1xf32>
    %34 = arith.subf %33, %32 : vector<8x1xf32>
    %cst_11 = arith.constant 0.000000e+00 : f32
    %35 = vector.broadcast %cst_11 : f32 to vector<8x1xf32>
    %36 = arith.maximumf %34, %35 : vector<8x1xf32>
    %37 = arith.mulf %36, %36 : vector<8x1xf32>
    %cst_12 = arith.constant 1.000000e+00 : f32
    %38 = vector.broadcast %cst_12 : f32 to vector<8x1xf32>
    %39 = arith.mulf %38, %37 : vector<8x1xf32>
    %40 = arith.mulf %39, %29 : vector<8x1xf32>
    %41 = vector.shape_cast %40 : vector<8x1xf32> to vector<1x8x1xf32>
    %cst_13 = arith.constant dense<0.000000e+00> : vector<1xf32>
    %42 = vector.multi_reduction <add>, %41, %cst_13 [1, 2] : vector<1x8x1xf32> to vector<1xf32>
    %43 = vector.shape_cast %42 : vector<1xf32> to vector<1x1x1xf32>
    %44 = vector.extract %43[0, 0, 0] : f32 from vector<1x1x1xf32>
    %45 = vector.broadcast %44 : f32 to vector<1x8x128xf32>
    %c0_14 = arith.constant 0 : index
    %c0_15 = arith.constant 0 : index
    %c0_16 = arith.constant 0 : index
    %46 = vector.load %arg3[%c0_14, %c0_15, %c0_16] : memref<1x8x128xf32, #tpu.memory_space<vmem>>, vector<1x8x128xf32>
    tpu.vector_store %arg3[%c0_14, %c0_15, %c0_16], %45 {strides = array<i32>} : memref<1x8x128xf32, #tpu.memory_space<vmem>>, vector<1x8x128xf32>,
    return
  }
  func.func @transform_0(%arg0: i32) -> (i32, i32) {
    %c0_i32 = arith.constant 0 : i32
    %c0_i32_0 = arith.constant 0 : i32
    return %arg0, %c0_i32 : i32, i32
  }
  func.func @transform_1(%arg0: i32) -> (i32, i32) {
    %c0_i32 = arith.constant 0 : i32
    %c0_i32_0 = arith.constant 0 : i32
    return %arg0, %c0_i32 : i32, i32
  }
  func.func @transform_2(%arg0: i32) -> (i32, i32, i32) {
    %c0_i32 = arith.constant 0 : i32
    %c0_i32_0 = arith.constant 0 : i32
    %c0_i32_1 = arith.constant 0 : i32
    return %arg0, %c0_i32, %c0_i32_0 : i32, i32, i32
  }
}

</mosaic_0001>

<bundles_post_ra>
// kernel: tpu_custom_call.1
= control target key start
LH: loop header
LB: loop body
LE: loop exit
PB: predicated region body
PF: predicated region fallthrough
CT: control target
= control target key end

     0   :  { %vm14_vm0 = vcmask 261120   ;;  %s142_s0 = inlined_call_operand.vmem [shape: f32[8,32], index: 0, kind: input, shape index: {}]   ;;  %s143_s1 = inlined_call_operand.vmem [shape: s32[8,1], index: 1, kind: input, shape index: {}]   ;;  %s144_s2 = inlined_call_operand.hbm [shape: f32[1,8,128], index: 2, kind: output, shape index: {}]  }
   0x1   :  { %v12_v0 = vld [vmem:[%s142_s0] sm:$0xff] }
   0x2   :  { %7 = vsyncpa [#allocation3], 0  ;;  %v15_v1 = vsel %vm14_vm0, %v12_v0, -inf  ;;  %v113_v2 = vmov 0   ;;  %v13_v3 = vld [vmem:[%s143_s1] sm:$0xff]  ;;  %v18_v7 = vlaneseq  ;;  %vm53_vm2 = vcmask 7168  }
   0x3   :  { %84 = vset.pattern.permute.xlu0 %v113_v2  ;;  %s114_s0 = smov [#allocation2]  }
   0x4   :  { %16 = vmax.xlane.f32.xlu0 %v15_v1  ;;  %v19_v8 = vand.u32 127, %v18_v7  ;;  %s72_s1 = sshll.u32 %s114_s0, 4  ;;  %s73_s1 = int_to_ptr.vmem [resolvable:$true] %s72_s1 }
   0x5   :  { %s91_s14 = scalar_lea.vmem %s73_s1, 128  ;;  %p96_p1 = scmp.lt.s32.totalorder %s73_s1, %s73_s1 }
   0x6   :  { %p92_p0 = scmp.ne.s32.totalorder %s73_s1, %s91_s14  ;;  %p97_p2 = scmp.lt.s32.totalorder %s91_s14, %s91_s14 }
   0x8   :  { %p98_p3 = por %p97_p2, %p96_p1 }
   0xa   :  { %p99_p4 = pnand %p98_p3, %p92_p0 }
  0x1a   :  { %21 = vperm.xlu0 %84, %v13_v3  }
  0x8d   :  { %v17_v4 = vpop.xlane.xlu0 %16 }
  0x8e   :  { %v28_v5 = vsub.f32 %v12_v0, %v17_v4 }
  0x90   :  { %v29_v6 = vmul.f32 1.442695, %v28_v5 }
  0x92   :  { %85 = vpow2.f32 %v29_v6 }
  0x95   :  { %v22_v9 = vpop.permute.xlu0 %21 }
  0x96   :  { %vm23_vm1 = vcmp.eq.s32.totalorder %v19_v8, %v22_v9 }
  0x97   :  { %v24_v11 = vsel %vm23_vm1, %v12_v0, 0.0 }
  0x98   :  { %v25_v13 = vsel %vm14_vm0, %v24_v11, 0.0 }
  0x9f   :  { %v86_v10 = vpop.eup %85 }
  0xa0   :  { %v31_v12 = vsel %vm14_vm0, %v86_v10, 0.0 }
  0xa1   :  { %32 = vadd.xlane.f32.xlu1 %v31_v12 }
  0xa5   :  { %26 = vadd.xlane.f32.xlu1 %v25_v13 }
 0x12a   :  { %v33_v14 = vpop.xlane.xlu1 %32 }
 0x12b   :  { %87 = vlog2.f32 %v33_v14 }
 0x12e   :  { %v27_v15 = vpop.xlane.xlu1 %26 }
 0x12f   :  { %v36_v18 = vsub.f32 %v17_v4, %v27_v15 }
 0x138   :  { %v88_v16 = vpop.eup %87 }
 0x139   :  { %v35_v17 = vmul.f32 0.6931472, %v88_v16 }
 0x13b   :  { %v37_v19 = vadd.f32 %v36_v18, %v35_v17 }
 0x13d   :  { %v38_v20 = vmax.f32 %v37_v19, 0.0 }
 0x13f   :  { %v46_v21 = vsub.f32 0.0, %v38_v20 }
 0x141   :  { %v47_v22 = vmul.f32 1.442695, %v46_v21 }
 0x143   :  { %89 = vpow2.f32 %v47_v22 }
 0x150   :  { %v90_v23 = vpop.eup %89 }
 0x151   :  { %v49_v24 = vsub.f32 1.0, %v90_v23 }
 0x153   :  { %v50_v25 = vmax.f32 %v49_v24, 0.0 }
 0x155   :  { %v51_v26 = vmul.f32 %v50_v25, %v50_v25 }
 0x157   :  { %v52_v27 = vmul.f32 %v51_v26, %v38_v20 }
 0x159   :  { %v54_v28 = vsel %vm53_vm2, %v52_v27, 0.0 }
 0x15a   :  { %55 = vadd.xlane.f32.xlu1 %v54_v28 }
 0x1e3   :  { %v56_v29 = vpop.xlane.xlu1 %55 }
 0x1e4   :  { %v57_v30 = vrot.slane %v56_v29, 4 }
 0x1e6   :  { %v58_v31 = vadd.f32 %v57_v30, %v56_v29 }
 0x1e8   :  { %v59_v32 = vrot.slane %v58_v31, 2 }
 0x1ea   :  { %v60_v33 = vadd.f32 %v59_v32, %v58_v31 }
 0x1ec   :  { %v61_v34 = vrot.slane %v60_v33, 1 }
 0x1ee   :  { %v62_v35 = vadd.f32 %v61_v34, %v60_v33 }
 0x1f0   :  { %80 = vpush %v62_v35 }
 0x221   :  { %s81_s13 = spop %80 }
 0x222   :  { %v64_v36 = vstv %s81_s13 }
 0x223   :  { %65 = vst [vmem:[#allocation2] sm:$0xff] %v64_v36 }
 0x224   :  { %102 = shalt.err (!%p99_p4)
}
 0x225   :  { %75 = dma.vmem_to_hbm [thread:$0]  %s73_s1, 128, %s144_s2, [#allocation3]  }
 0x226   :  { %111 = dma.done.wait [#allocation3], 128  }
 0x227   :  { %112 = vsyncadd [#allocation3], 4294967168 }
 0x228   :  { %79 = vsyncpa [#allocation3], 1 }

</bundles_post_ra>
